<compile_context>
chip_gen: v7x
topology: tpu7x:2x2x1
jax: 0.10.0
libtpu: 0.0.40
codegen_flags: <defaults>
</compile_context>

<pallas_src>
import functools

import jax
import jax.numpy as jnp
from jax.experimental import pallas as pl
from jax.experimental.pallas import tpu as pltpu


def _beta_logreg_kernel(x_ref, w1_ref, b1_ref, w2_ref, b2_ref, o_ref):
    # x:  [TB, F]     w1: [F, H]   b1: [1, H]
    # w2: [H, O]      b2: [1, O]   o:  [TB, O]
    x = x_ref[...]
    # First linear layer (MXU matmul, f32 accumulation).
    h = jnp.dot(x, w1_ref[...], preferred_element_type=jnp.float32) + b1_ref[...]
    # SiLU activation: h * sigmoid(h)  (sigmoid -> EUP, mul -> VPU).
    h = h * jax.nn.sigmoid(h)
    # Output linear layer.
    y = jnp.dot(h, w2_ref[...], preferred_element_type=jnp.float32) + b2_ref[...]
    # exp -> Beta distribution parameters (alpha, beta), strictly positive.
    o_ref[...] = jnp.exp(y).astype(o_ref.dtype)


def _round_up(n, m):
    return ((n + m - 1) // m) * m


@functools.partial(jax.jit, static_argnames=("tile_b",))
def beta_logistic_regression(x, w1, b1, w2, b2, *, tile_b=1024):
    """Forward pass of BetaLogisticRegression as a single fused Pallas kernel.

    x:  [B, input_size] float32
    w1: [input_size, hidden]   b1: [1, hidden]
    w2: [hidden, output_size]  b2: [1, output_size]
    returns [B, output_size] float32
    """
    B, F = x.shape
    H = w1.shape[1]
    O = w2.shape[1]

    # Batch tile: multiple of 8 (sublane), capped at tile_b.  Pad batch so the
    # grid divides evenly; padded rows are sliced off after the call.
    tb = _round_up(min(tile_b, _round_up(B, 8)), 8)
    b_pad = _round_up(B, tb)
    if b_pad != B:
        x = jnp.pad(x, ((0, b_pad - B), (0, 0)))

    grid = (b_pad // tb,)

    out = pl.pallas_call(
        _beta_logreg_kernel,
        out_shape=jax.ShapeDtypeStruct((b_pad, O), jnp.float32),
        grid_spec=pl.GridSpec(
            grid=grid,
            in_specs=[
                # x tiles stream through VMEM (double-buffered by Pallas).
                pl.BlockSpec((tb, F), lambda i: (i, 0)),
                # Weights / biases: constant block index -> resident in VMEM.
                pl.BlockSpec((F, H), lambda i: (0, 0)),
                pl.BlockSpec((1, H), lambda i: (0, 0)),
                pl.BlockSpec((H, O), lambda i: (0, 0)),
                pl.BlockSpec((1, O), lambda i: (0, 0)),
            ],
            out_specs=pl.BlockSpec((tb, O), lambda i: (i, 0)),
        ),
        compiler_params=pltpu.CompilerParams(
            dimension_semantics=("parallel",),
        ),
    )(x, w1, b1, w2, b2)

    return out[:B] if b_pad != B else out


def init_params(key, input_size, hidden, output_size):
    """Deterministic init mimicking nn.Linear default (U(-1/sqrt(fan_in), +))."""
    k1, k2, k3, k4 = jax.random.split(key, 4)
    bound1 = 1.0 / (input_size ** 0.5)
    bound2 = 1.0 / (hidden ** 0.5)
    # Stored transposed relative to PyTorch (fan_in is still the input dim).
    w1 = jax.random.uniform(k1, (input_size, hidden), jnp.float32, -bound1, bound1)
    b1 = jax.random.uniform(k2, (1, hidden), jnp.float32, -bound1, bound1)
    w2 = jax.random.uniform(k3, (hidden, output_size), jnp.float32, -bound2, bound2)
    b2 = jax.random.uniform(k4, (1, output_size), jnp.float32, -bound2, bound2)
    return w1, b1, w2, b2


def reference_forward(x, w1, b1, w2, b2):
    """Pure-JAX reference for correctness checking."""
    h = x @ w1 + b1
    h = h * jax.nn.sigmoid(h)
    return jnp.exp(h @ w2 + b2)


if __name__ == "__main__":
    key = jax.random.PRNGKey(0)
    kx, kp = jax.random.split(key)

    input_size = 160          # hidden defaults to input_size // 5 = 32
    hidden = input_size // 5  # 32
    output_size = 2           # alpha, beta

    w1, b1, w2, b2 = init_params(kp, input_size, hidden, output_size)

    # 1) Small shipped-size check (B=8): single grid step, padding path off.
    batch = 8
    x = jax.random.normal(kx, (batch, input_size), jnp.float32)
    out = jax.block_until_ready(beta_logistic_regression(x, w1, b1, w2, b2))
    ref = reference_forward(x, w1, b1, w2, b2)
    assert out.shape == (batch, output_size), out.shape
    assert jnp.allclose(out, ref, rtol=1e-5, atol=1e-5)

    # 2) Larger batch exercising the pipelined multi-tile grid (grid=(2,)).
    batch_big = 2048
    xb = jax.random.normal(jax.random.PRNGKey(1), (batch_big, input_size),
                           jnp.float32)
    outb = jax.block_until_ready(beta_logistic_regression(xb, w1, b1, w2, b2))
    refb = reference_forward(xb, w1, b1, w2, b2)
    assert outb.shape == (batch_big, output_size), outb.shape
    assert jnp.allclose(outb, refb, rtol=1e-5, atol=1e-5)

    # 3) Non-multiple batch exercising the padding/slice path.
    batch_odd = 100
    xo = jax.random.normal(jax.random.PRNGKey(2), (batch_odd, input_size),
                           jnp.float32)
    outo = jax.block_until_ready(beta_logistic_regression(xo, w1, b1, w2, b2))
    refo = reference_forward(xo, w1, b1, w2, b2)
    assert outo.shape == (batch_odd, output_size), outo.shape
    assert jnp.allclose(outo, refo, rtol=1e-5, atol=1e-5)

    print("KERNEL_OK")
</pallas_src>

<mosaic_0001>
module attributes {stable_mosaic.version = 11 : i64} {
  func.func @_beta_logreg_kernel(%arg0: i32, %arg1: memref<8x160xf32, #tpu.memory_space<vmem>>, %arg2: memref<160x32xf32, #tpu.memory_space<vmem>>, %arg3: memref<1x32xf32, #tpu.memory_space<vmem>>, %arg4: memref<32x2xf32, #tpu.memory_space<vmem>>, %arg5: memref<1x2xf32, #tpu.memory_space<vmem>>, %arg6: memref<8x2xf32, #tpu.memory_space<vmem>>) attributes {dimension_semantics = [#tpu.dimension_semantics<parallel>], iteration_bounds = array<i64: 1>, scalar_prefetch = 0 : i64, scratch_operands = 0 : i64, tpu.core_type = #tpu.core_type<tc>, window_params = [{transform_indices = @transform_0, window_bounds = array<i64: 8, 160>}, {pipeline_mode = #tpu.pipeline_mode<synchronous>, transform_indices = @transform_1, window_bounds = array<i64: 160, 32>}, {pipeline_mode = #tpu.pipeline_mode<synchronous>, transform_indices = @transform_2, window_bounds = array<i64: 1, 32>}, {pipeline_mode = #tpu.pipeline_mode<synchronous>, transform_indices = @transform_3, window_bounds = array<i64: 32, 2>}, {pipeline_mode = #tpu.pipeline_mode<synchronous>, transform_indices = @transform_4, window_bounds = array<i64: 1, 2>}, {transform_indices = @transform_5, window_bounds = array<i64: 8, 2>}]} {
    %c0 = arith.constant 0 : index
    %c0_0 = arith.constant 0 : index
    %0 = vector.load %arg1[%c0, %c0_0] : memref<8x160xf32, #tpu.memory_space<vmem>>, vector<8x160xf32>
    %c0_1 = arith.constant 0 : index
    %c0_2 = arith.constant 0 : index
    %1 = vector.load %arg2[%c0_1, %c0_2] : memref<160x32xf32, #tpu.memory_space<vmem>>, vector<160x32xf32>
    %cst = arith.constant dense<0.000000e+00> : vector<8x32xf32>
    %2 = tpu.matmul %0, %1, %cst {dimension_numbers = #tpu.dot_dimension_numbers<[1], [0], [0], [1], [0, 0, 1, 1], [], []>} : vector<8x160xf32>, vector<160x32xf32>, vector<8x32xf32> -> vector<8x32xf32>
    %c0_3 = arith.constant 0 : index
    %c0_4 = arith.constant 0 : index
    %3 = vector.load %arg3[%c0_3, %c0_4] : memref<1x32xf32, #tpu.memory_space<vmem>>, vector<1x32xf32>
    %4 = vector.broadcast %3 : vector<1x32xf32> to vector<8x32xf32>
    %5 = arith.addf %2, %4 : vector<8x32xf32>
    %6 = arith.negf %5 : vector<8x32xf32>
    %7 = math.exp %6 : vector<8x32xf32>
    %cst_5 = arith.constant 1.000000e+00 : f32
    %8 = vector.broadcast %cst_5 : f32 to vector<8x32xf32>
    %9 = arith.addf %8, %7 : vector<8x32xf32>
    %10 = arith.divf %8, %9 : vector<8x32xf32>
    %11 = arith.mulf %5, %10 : vector<8x32xf32>
    %c0_6 = arith.constant 0 : index
    %c0_7 = arith.constant 0 : index
    %12 = vector.load %arg4[%c0_6, %c0_7] : memref<32x2xf32, #tpu.memory_space<vmem>>, vector<32x2xf32>
    %cst_8 = arith.constant dense<0.000000e+00> : vector<8x2xf32>
    %13 = tpu.matmul %11, %12, %cst_8 {dimension_numbers = #tpu.dot_dimension_numbers<[1], [0], [0], [1], [0, 0, 1, 1], [], []>} : vector<8x32xf32>, vector<32x2xf32>, vector<8x2xf32> -> vector<8x2xf32>
    %c0_9 = arith.constant 0 : index
    %c0_10 = arith.constant 0 : index
    %14 = vector.load %arg5[%c0_9, %c0_10] : memref<1x2xf32, #tpu.memory_space<vmem>>, vector<1x2xf32>
    %15 = vector.broadcast %14 : vector<1x2xf32> to vector<8x2xf32>
    %16 = arith.addf %13, %15 : vector<8x2xf32>
    %17 = math.exp %16 : vector<8x2xf32>
    %c0_11 = arith.constant 0 : index
    %c0_12 = arith.constant 0 : index
    %18 = vector.load %arg6[%c0_11, %c0_12] : memref<8x2xf32, #tpu.memory_space<vmem>>, vector<8x2xf32>
    tpu.vector_store %arg6[%c0_11, %c0_12], %17 {strides = array<i32>} : memref<8x2xf32, #tpu.memory_space<vmem>>, vector<8x2xf32>,
    return
  }
  func.func @transform_0(%arg0: i32) -> (i32, i32) {
    %c0_i32 = arith.constant 0 : i32
    %c0_i32_0 = arith.constant 0 : i32
    return %arg0, %c0_i32 : i32, i32
  }
  func.func @transform_1(%arg0: i32) -> (i32, i32) {
    %c0_i32 = arith.constant 0 : i32
    %c0_i32_0 = arith.constant 0 : i32
    %c0_i32_1 = arith.constant 0 : i32
    return %c0_i32, %c0_i32_0 : i32, i32
  }
  func.func @transform_2(%arg0: i32) -> (i32, i32) {
    %c0_i32 = arith.constant 0 : i32
    %c0_i32_0 = arith.constant 0 : i32
    %c0_i32_1 = arith.constant 0 : i32
    return %c0_i32, %c0_i32_0 : i32, i32
  }
  func.func @transform_3(%arg0: i32) -> (i32, i32) {
    %c0_i32 = arith.constant 0 : i32
    %c0_i32_0 = arith.constant 0 : i32
    %c0_i32_1 = arith.constant 0 : i32
    return %c0_i32, %c0_i32_0 : i32, i32
  }
  func.func @transform_4(%arg0: i32) -> (i32, i32) {
    %c0_i32 = arith.constant 0 : i32
    %c0_i32_0 = arith.constant 0 : i32
    %c0_i32_1 = arith.constant 0 : i32
    return %c0_i32, %c0_i32_0 : i32, i32
  }
  func.func @transform_5(%arg0: i32) -> (i32, i32) {
    %c0_i32 = arith.constant 0 : i32
    %c0_i32_0 = arith.constant 0 : i32
    return %arg0, %c0_i32 : i32, i32
  }
}

</mosaic_0001>

<bundles_post_ra>
// kernel: beta_logistic_regression.1
= control target key start
LH: loop header
LB: loop body
LE: loop exit
PB: predicated region body
PF: predicated region fallthrough
CT: control target
= control target key end

     0   :  { %v288_v0 = vmov 0.0|0.0   ;;  %vm49_vm0 = vcmask 261120   ;;  %vm289_vm1 = vmmov 0   ;;  %v290_v39 = vmov 0.0   ;;  %s410_s1 = inlined_call_operand.vmem [shape: f32[160,32], index: 1, kind: input, shape index: {}]   ;;  %s411_s0 = inlined_call_operand.vmem [shape: f32[8,160], index: 0, kind: input, shape index: {}]   ;;  %s412_s3 = inlined_call_operand.vmem [shape: f32[32,2], index: 3, kind: input, shape index: {}]   ;;  %s413_s2 = inlined_call_operand.vmem [shape: f32[1,32], index: 2, kind: input, shape index: {}]   ;;  %s414_s4 = inlined_call_operand.vmem [shape: f32[1,2], index: 4, kind: input, shape index: {}]   ;;  %s415_s5 = inlined_call_operand.vmem [shape: f32[8,2], index: 5, kind: output, shape index: {}]  }
   0x1   :  { %243 = vmatprep.subr.bf16.mxu0 %v288_v0  ;;  %v22_v1 = vld [vmem:[%s410_s1] sm:$0xff]  ;;  %v23_v2 = vld [vmem:[%s410_s1 + $0x8] sm:$0xff]  ;;  %v24_v3 = vld [vmem:[%s410_s1 + $0x10] sm:$0xff]  ;;  %273 = vmatprep.subr.bf16.mxu1 %v288_v0  ;;  %vm216_vm2 = vcmask 15360  }
   0x2   :  { %v244_v4 = vpack.c.bf16 %v23_v2, %v22_v1  ;;  %v25_v5 = vld [vmem:[%s410_s1 + $0x18] sm:$0xff]  ;;  %v26_v7 = vld [vmem:[%s410_s1 + $0x20] sm:$0xff]  ;;  %v27_v8 = vld [vmem:[%s410_s1 + $0x28] sm:$0xff]  ;;  %240 = vmatprep.mubr.msk.f32.mxu1 %vm289_vm1, %v290_v39 }
   0x3   :  { %v247_v6 = vpack.c.bf16 %v25_v5, %v24_v3  ;;  %v21_v9 = vld [vmem:[%s411_s0 + $0x8] sm:$0xff]  ;;  %v250_v10 = vpack.c.bf16 %v27_v8, %v26_v7  ;;  %v28_v11 = vld [vmem:[%s410_s1 + $0x30] sm:$0xff]  ;;  %v29_v12 = vld [vmem:[%s410_s1 + $0x38] sm:$0xff] }
   0x4   :  { %245 = vmatpush1.bf16.msra.mxu0 %v244_v4  ;;  %223 = vmatprep.mubr.msk.f32.mxu0 %vm49_vm0, %v21_v9  ;;  %v253_v13 = vpack.c.bf16 %v29_v12, %v28_v11  ;;  %v30_v14 = vld [vmem:[%s410_s1 + $0x40] sm:$0xff]  ;;  %v31_v15 = vld [vmem:[%s410_s1 + $0x48] sm:$0xff]  ;;  %v32_v17 = vld [vmem:[%s410_s1 + $0x50] sm:$0xff] }
   0x5   :  { %246 = vmatprep.subr.bf16.mxu0 %v288_v0  ;;  %v256_v16 = vpack.c.bf16 %v31_v15, %v30_v14  ;;  %v33_v18 = vld [vmem:[%s410_s1 + $0x58] sm:$0xff]  ;;  %v34_v20 = vld [vmem:[%s410_s1 + $0x60] sm:$0xff]  ;;  %v35_v21 = vld [vmem:[%s410_s1 + $0x68] sm:$0xff] }
   0x6   :  { %v259_v19 = vpack.c.bf16 %v33_v18, %v32_v17  ;;  %v262_v22 = vpack.c.bf16 %v35_v21, %v34_v20  ;;  %v36_v23 = vld [vmem:[%s410_s1 + $0x70] sm:$0xff]  ;;  %v37_v24 = vld [vmem:[%s410_s1 + $0x78] sm:$0xff]  ;;  %v38_v26 = vld [vmem:[%s410_s1 + $0x80] sm:$0xff] }
   0x7   :  { %v265_v25 = vpack.c.bf16 %v37_v24, %v36_v23  ;;  %v39_v27 = vld [vmem:[%s410_s1 + $0x88] sm:$0xff]  ;;  %v40_v29 = vld [vmem:[%s410_s1 + $0x90] sm:$0xff]  ;;  %v41_v30 = vld [vmem:[%s410_s1 + $0x98] sm:$0xff] }
   0x8   :  { %248 = vmatpush1.bf16.msra.mxu0 %v247_v6  ;;  %v268_v28 = vpack.c.bf16 %v39_v27, %v38_v26  ;;  %v271_v31 = vpack.c.bf16 %v41_v30, %v40_v29  ;;  %v20_v32 = vld [vmem:[%s411_s0] sm:$0xff]  ;;  %v131_v34 = vld [vmem:[%s412_s3 + $0x8] sm:$0xff]  ;;  %v132_v36 = vld [vmem:[%s412_s3 + $0x10] sm:$0xff] }
   0x9   :  { %249 = vmatprep.subr.bf16.mxu0 %v288_v0  ;;  %v130_v33 = vld [vmem:[%s412_s3] sm:$0xff]  ;;  %v133_v37 = vld [vmem:[%s412_s3 + $0x18] sm:$0xff] }
   0xa   :  { %v274_v35 = vpack.c.bf16 %v131_v34, %v130_v33  ;;  %v277_v38 = vpack.c.bf16 %v133_v37, %v132_v36  ;;  %v222_v40 = vld [vmem:[%s413_s2] ss:$0 sm:$0xff] }
   0xb   :  { %v225_v49 = vld [vmem:[%s414_s4] ss:$0 sm:$0xff] }
   0xc   :  { %251 = vmatpush1.bf16.msra.mxu0 %v250_v10  ;;  %275 = vmatpush3.bf16.msra.mxu1 %v274_v35 }
   0xd   :  { %252 = vmatprep.subr.bf16.mxu0 %v288_v0  ;;  %276 = vmatprep.subr.bf16.mxu1 %v288_v0 }
  0x10   :  { %254 = vmatpush1.bf16.msra.mxu0 %v253_v13  ;;  %278 = vmatpush3.bf16.msra.mxu1 %v277_v38 }
  0x11   :  { %255 = vmatprep.subr.bf16.mxu0 %v288_v0 }
  0x14   :  { %257 = vmatpush1.bf16.msra.mxu0 %v256_v16 }
  0x15   :  { %258 = vmatprep.subr.bf16.mxu0 %v288_v0 }
  0x18   :  { %260 = vmatpush1.bf16.msra.mxu0 %v259_v19 }
  0x19   :  { %261 = vmatprep.subr.bf16.mxu0 %v288_v0 }
  0x1c   :  { %263 = vmatpush1.bf16.msra.mxu0 %v262_v22 }
  0x1d   :  { %264 = vmatprep.subr.bf16.mxu0 %v288_v0 }
  0x20   :  { %266 = vmatpush1.bf16.msra.mxu0 %v265_v25 }
  0x21   :  { %267 = vmatprep.subr.bf16.mxu0 %v288_v0 }
  0x24   :  { %269 = vmatpush1.bf16.msra.mxu0 %v268_v28 }
  0x25   :  { %270 = vmatprep.subr.bf16.mxu0 %v288_v0 }
  0x28   :  { %272 = vmatpush1.bf16.msra.mxu0 %v271_v31 }
  0x2b   :  { %118 = vmatmul.mubr.f32.vlgmr.msra.gmra.mrb[0].mxu0 %v20_v32 }
  0xfe   :  { %v119_v41 = vpop.f32.mrb[0].mxu0 }
  0xff   :  { %v120_v42 = vadd.f32 %v222_v40, %v119_v41  ;;  %v121_v43 = vpop.f32.mrb[1].mxu0 }
 0x101   :  { %v224_v44 = vmul.f32 -1.442695, %v120_v42 }
 0x103   :  { %282 = vpow2.f32 %v224_v44 }
 0x10d   :  { %v283_v45 = vpop.eup %282 }
 0x10e   :  { %v126_v46 = vadd.f32 1.0, %v283_v45 }
 0x110   :  { %284 = vrcp.f32 %v126_v46 }
 0x11a   :  { %v285_v47 = vpop.eup %284 }
 0x11b   :  { %v129_v48 = vmul.f32 %v285_v47, %v120_v42 }
 0x11d   :  { %241 = vmatmul.mubr.msk.f32.vlgmr.msra.gmra.mrb[0].mxu1 %vm49_vm0, %v129_v48 }
 0x1f0   :  { %v210_v50 = vpop.f32.mrb[0].mxu1 }
 0x1f1   :  { %v211_v51 = vadd.f32 %v225_v49, %v210_v50  ;;  %v242_v52 = vpop.f32.mrb[1].mxu1 }
 0x1f3   :  { %v214_v53 = vmul.f32 1.442695, %v211_v51 }
 0x1f5   :  { %286 = vpow2.f32 %v214_v53 }
 0x1ff   :  { %v287_v54 = vpop.eup %286 }
 0x200   :  { %217 = vst.msk [vmem:[%s415_s5] sm:$0xff] %vm216_vm2, %v287_v54 }

</bundles_post_ra>
